<compile_context>
chip_gen: v7x
topology: tpu7x:2x2x1
jax: 0.10.0
libtpu: 0.0.40
codegen_flags: <defaults>
</compile_context>

<pallas_src>
import functools

import jax
import jax.numpy as jnp
from jax import lax
from jax.experimental import pallas as pl
from jax.experimental.pallas import tpu as pltpu

INPUT_DIM = 25
HIDDEN = (64, 32, 16)
BN_EPS = 1e-5
_LANE = 128


def _mlp_kernel(x_ref,
                w1_ref, b1_ref,
                w2_ref, b2_ref,
                w3_ref, b3_ref,
                w4_ref, b4_ref,
                o_ref):
    """Fused forward: 3x (BN-folded Linear -> ReLU) + Linear head.

    x_ref is a (TB, 25) natural-layout tile; the first dot_general contracts
    the 25-dim of both operands, giving feature-major (C, TB) activations
    (batch on lanes). Matmuls run in the weight dtype (f32 or bf16) with f32
    MXU accumulation; bias add / ReLU / head stay in f32.
    """
    cdt = w1_ref.dtype

    def to_compute(a):
        return a if a.dtype == cdt else a.astype(cdt)   # in-VMEM cast (bf16 path)

    x = to_compute(x_ref[...])                           # (TB, 25)

    # Layer 1: contract x's last dim (25) with w1's last dim (25) -> (64, TB).
    # (Dropout = identity in eval mode.)
    h = lax.dot_general(w1_ref[...], x,
                        dimension_numbers=(((1,), (1,)), ((), ())),
                        preferred_element_type=jnp.float32)
    h = jnp.maximum(h + b1_ref[...], 0.0)

    # Layer 2: (32,64) @ (64,TB) -> (32,TB)
    h = jnp.dot(w2_ref[...], to_compute(h), preferred_element_type=jnp.float32)
    h = jnp.maximum(h + b2_ref[...], 0.0)

    # Layer 3: (16,32) @ (32,TB) -> (16,TB)
    h = jnp.dot(w3_ref[...], to_compute(h), preferred_element_type=jnp.float32)
    h = jnp.maximum(h + b3_ref[...], 0.0)

    # Head: (1,16)@(16,TB) as VPU broadcast-multiply + sublane reduce (no M=1
    # MXU matmul); lane-dense (1, TB) output row.
    o = jnp.sum(h * w4_ref[...], axis=0, keepdims=True) + b4_ref[...]
    o_ref[...] = o.astype(o_ref.dtype)


def _fold_bn_into_linear(w, b, bn, eps=BN_EPS):
    """Fold eval-mode BatchNorm1d into the preceding Linear (w: (out, in))."""
    gamma, beta, rmean, rvar = bn
    scale = gamma / jnp.sqrt(rvar + eps)                 # (out,)
    w_f = w * scale[:, None]
    b_f = b * scale + (beta - rmean * scale)
    return w_f, b_f


def _round_up(n, m):
    return ((n + m - 1) // m) * m


def prepare_params(params, matmul_dtype=jnp.float32):
    """Fold BN into the Linears and pre-cast ONCE (hoisted out of the per-call
    path). Returns the flat tuple of kernel operands."""
    (w1, b1, bn1), (w2, b2, bn2), (w3, b3, bn3), (w4, b4) = params
    w1f, b1f = _fold_bn_into_linear(w1, b1, bn1)
    w2f, b2f = _fold_bn_into_linear(w2, b2, bn2)
    w3f, b3f = _fold_bn_into_linear(w3, b3, bn3)

    def col(b):
        return b.astype(jnp.float32).reshape(-1, 1)      # (C, 1) f32 bias

    return (
        w1f.astype(matmul_dtype), col(b1f),
        w2f.astype(matmul_dtype), col(b2f),
        w3f.astype(matmul_dtype), col(b3f),
        w4.astype(jnp.float32).reshape(-1, 1),           # (16, 1) head weights (VPU, f32)
        b4.astype(jnp.float32).reshape(1, 1),            # (1, 1)  head bias
    )


@functools.partial(jax.jit, static_argnames=("block_batch",))
def bike_volume_nn_forward(x, kernel_params, *, block_batch=8192):
    """x: (B, 25) float32, kernel_params from prepare_params() -> (B, 1) f32."""
    B = x.shape[0]

    # Batch tile: 128-aligned (defensively re-round block_batch), >= 2 grid
    # steps when possible (v7x: 2 TCs + double-buffered x DMA), capped at
    # block_batch to amortize per-step overhead with a fat tile.
    block_batch = max(_LANE, _round_up(block_batch, _LANE))
    tb = max(_LANE, min(block_batch, _round_up(pl.cdiv(B, 2), _LANE)))
    grid = (pl.cdiv(B, tb),)

    in_specs = [pl.BlockSpec((tb, INPUT_DIM), lambda i: (i, 0))]   # natural layout, tiled on batch
    in_specs += [pl.BlockSpec(a.shape, lambda i: (0, 0)) for a in kernel_params]
    out_spec = pl.BlockSpec((1, tb), lambda i: (0, i))             # lane-dense output row

    flops = 2 * B * (25 * 64 + 64 * 32 + 32 * 16 + 16 * 1)
    param_bytes = sum(int(a.size) * a.dtype.itemsize for a in kernel_params)
    bytes_accessed = B * (INPUT_DIM + 1) * 4 + param_bytes

    out = pl.pallas_call(
        _mlp_kernel,
        grid=grid,
        in_specs=in_specs,
        out_specs=out_spec,
        out_shape=jax.ShapeDtypeStruct((1, B), jnp.float32),
        compiler_params=pltpu.CompilerParams(
            dimension_semantics=("parallel",)),
        cost_estimate=pl.CostEstimate(
            flops=flops, transcendentals=0, bytes_accessed=bytes_accessed),
    )(x, *kernel_params)

    return out[0, :, None]                               # (B, 1): slice/reshape, no transpose


def init_params(key):
    """Deterministic parameter init mimicking PyTorch defaults.

    Linear: W (out, in), b ~ U(-1/sqrt(fan_in), 1/sqrt(fan_in)).
    BatchNorm1d: gamma=1, beta=0, plus synthetic (deterministic) running stats.
    """
    dims = (INPUT_DIM,) + HIDDEN + (1,)
    params = []
    for i in range(len(dims) - 1):
        fan_in, fan_out = dims[i], dims[i + 1]
        key, kw, kb, km, kv = jax.random.split(key, 5)
        bound = 1.0 / jnp.sqrt(jnp.float32(fan_in))
        w = jax.random.uniform(kw, (fan_out, fan_in), jnp.float32, -bound, bound)
        b = jax.random.uniform(kb, (fan_out,), jnp.float32, -bound, bound)
        if i < len(dims) - 2:  # hidden layers have BatchNorm1d
            gamma = jnp.ones((fan_out,), jnp.float32)
            beta = jnp.zeros((fan_out,), jnp.float32)
            running_mean = 0.1 * jax.random.normal(km, (fan_out,), jnp.float32)
            running_var = 1.0 + 0.1 * jax.random.uniform(kv, (fan_out,), jnp.float32)
            params.append((w, b, (gamma, beta, running_mean, running_var)))
        else:
            params.append((w, b))
    return tuple(params)


def _reference(x, params):
    """Pure-JAX reference (eval-mode PyTorch semantics)."""
    (w1, b1, bn1), (w2, b2, bn2), (w3, b3, bn3), (w4, b4) = params
    h = x
    for w, b, bn in ((w1, b1, bn1), (w2, b2, bn2), (w3, b3, bn3)):
        g, bb, rm, rv = bn
        h = h @ w.T + b
        h = (h - rm) / jnp.sqrt(rv + BN_EPS) * g + bb
        h = jnp.maximum(h, 0.0)
    return h @ w4.T + b4


if __name__ == "__main__":
    key = jax.random.PRNGKey(0)
    key, kx = jax.random.split(key)

    B = 8
    x = jax.random.normal(kx, (B, INPUT_DIM), jnp.float32)
    params = init_params(key)
    ref = _reference(x, params)

    # f32 path (exact eval semantics); BN folding hoisted out of the forward.
    kp_f32 = prepare_params(params)
    out = jax.block_until_ready(bike_volume_nn_forward(x, kp_f32))
    assert out.shape == (B, 1), out.shape
    assert jnp.allclose(out, ref, atol=1e-4, rtol=1e-4), (out, ref)

    # Multi-step grid + partial last tile (B not a multiple of the batch tile).
    B2 = 300
    key, kx2 = jax.random.split(key)
    x2 = jax.random.normal(kx2, (B2, INPUT_DIM), jnp.float32)
    ref2 = _reference(x2, params)
    out2 = jax.block_until_ready(bike_volume_nn_forward(x2, kp_f32))
    assert out2.shape == (B2, 1), out2.shape
    assert jnp.allclose(out2, ref2, atol=1e-4, rtol=1e-4)

    # bf16 matmul-operand path (v6e/v7x option): x cast in-VMEM, f32 accumulate.
    kp_bf16 = prepare_params(params, matmul_dtype=jnp.bfloat16)
    out_bf16 = jax.block_until_ready(bike_volume_nn_forward(x, kp_bf16))
    assert out_bf16.shape == (B, 1), out_bf16.shape
    assert jnp.allclose(out_bf16, ref, atol=1e-1, rtol=1e-1), (out_bf16, ref)

    print("KERNEL_OK")
</pallas_src>

<mosaic_0001>
module attributes {stable_mosaic.version = 11 : i64} {
  func.func @_mlp_kernel(%arg0: i32, %arg1: memref<128x25xf32, #tpu.memory_space<vmem>>, %arg2: memref<64x25xf32, #tpu.memory_space<vmem>>, %arg3: memref<64x1xf32, #tpu.memory_space<vmem>>, %arg4: memref<32x64xf32, #tpu.memory_space<vmem>>, %arg5: memref<32x1xf32, #tpu.memory_space<vmem>>, %arg6: memref<16x32xf32, #tpu.memory_space<vmem>>, %arg7: memref<16x1xf32, #tpu.memory_space<vmem>>, %arg8: memref<16x1xf32, #tpu.memory_space<vmem>>, %arg9: memref<1x1xf32, #tpu.memory_space<vmem>>, %arg10: memref<1x128xf32, #tpu.memory_space<vmem>>) attributes {dimension_semantics = [#tpu.dimension_semantics<parallel>], iteration_bounds = array<i64: 1>, scalar_prefetch = 0 : i64, scratch_operands = 0 : i64, tpu.core_type = #tpu.core_type<tc>, window_params = [{transform_indices = @transform_0, window_bounds = array<i64: 128, 25>}, {pipeline_mode = #tpu.pipeline_mode<synchronous>, transform_indices = @transform_1, window_bounds = array<i64: 64, 25>}, {pipeline_mode = #tpu.pipeline_mode<synchronous>, transform_indices = @transform_2, window_bounds = array<i64: 64, 1>}, {pipeline_mode = #tpu.pipeline_mode<synchronous>, transform_indices = @transform_3, window_bounds = array<i64: 32, 64>}, {pipeline_mode = #tpu.pipeline_mode<synchronous>, transform_indices = @transform_4, window_bounds = array<i64: 32, 1>}, {pipeline_mode = #tpu.pipeline_mode<synchronous>, transform_indices = @transform_5, window_bounds = array<i64: 16, 32>}, {pipeline_mode = #tpu.pipeline_mode<synchronous>, transform_indices = @transform_6, window_bounds = array<i64: 16, 1>}, {pipeline_mode = #tpu.pipeline_mode<synchronous>, transform_indices = @transform_7, window_bounds = array<i64: 16, 1>}, {pipeline_mode = #tpu.pipeline_mode<synchronous>, transform_indices = @transform_8, window_bounds = array<i64: 1, 1>}, {transform_indices = @transform_9, window_bounds = array<i64: 1, 128>}]} {
    %c0 = arith.constant 0 : index
    %c0_0 = arith.constant 0 : index
    %0 = vector.load %arg1[%c0, %c0_0] : memref<128x25xf32, #tpu.memory_space<vmem>>, vector<128x25xf32>
    %c0_1 = arith.constant 0 : index
    %c0_2 = arith.constant 0 : index
    %1 = vector.load %arg2[%c0_1, %c0_2] : memref<64x25xf32, #tpu.memory_space<vmem>>, vector<64x25xf32>
    %cst = arith.constant dense<0.000000e+00> : vector<64x128xf32>
    %2 = tpu.matmul %1, %0, %cst {dimension_numbers = #tpu.dot_dimension_numbers<[1], [1], [0], [0], [0, 0, 1, 0], [], []>} : vector<64x25xf32>, vector<128x25xf32>, vector<64x128xf32> -> vector<64x128xf32>
    %c0_3 = arith.constant 0 : index
    %c0_4 = arith.constant 0 : index
    %3 = vector.load %arg3[%c0_3, %c0_4] : memref<64x1xf32, #tpu.memory_space<vmem>>, vector<64x1xf32>
    %4 = vector.broadcast %3 : vector<64x1xf32> to vector<64x128xf32>
    %5 = arith.addf %2, %4 : vector<64x128xf32>
    %cst_5 = arith.constant 0.000000e+00 : f32
    %6 = vector.broadcast %cst_5 : f32 to vector<64x128xf32>
    %7 = arith.maximumf %5, %6 : vector<64x128xf32>
    %c0_6 = arith.constant 0 : index
    %c0_7 = arith.constant 0 : index
    %8 = vector.load %arg4[%c0_6, %c0_7] : memref<32x64xf32, #tpu.memory_space<vmem>>, vector<32x64xf32>
    %cst_8 = arith.constant dense<0.000000e+00> : vector<32x128xf32>
    %9 = tpu.matmul %8, %7, %cst_8 {dimension_numbers = #tpu.dot_dimension_numbers<[1], [0], [0], [1], [0, 0, 1, 1], [], []>} : vector<32x64xf32>, vector<64x128xf32>, vector<32x128xf32> -> vector<32x128xf32>
    %c0_9 = arith.constant 0 : index
    %c0_10 = arith.constant 0 : index
    %10 = vector.load %arg5[%c0_9, %c0_10] : memref<32x1xf32, #tpu.memory_space<vmem>>, vector<32x1xf32>
    %11 = vector.broadcast %10 : vector<32x1xf32> to vector<32x128xf32>
    %12 = arith.addf %9, %11 : vector<32x128xf32>
    %cst_11 = arith.constant 0.000000e+00 : f32
    %13 = vector.broadcast %cst_11 : f32 to vector<32x128xf32>
    %14 = arith.maximumf %12, %13 : vector<32x128xf32>
    %c0_12 = arith.constant 0 : index
    %c0_13 = arith.constant 0 : index
    %15 = vector.load %arg6[%c0_12, %c0_13] : memref<16x32xf32, #tpu.memory_space<vmem>>, vector<16x32xf32>
    %cst_14 = arith.constant dense<0.000000e+00> : vector<16x128xf32>
    %16 = tpu.matmul %15, %14, %cst_14 {dimension_numbers = #tpu.dot_dimension_numbers<[1], [0], [0], [1], [0, 0, 1, 1], [], []>} : vector<16x32xf32>, vector<32x128xf32>, vector<16x128xf32> -> vector<16x128xf32>
    %c0_15 = arith.constant 0 : index
    %c0_16 = arith.constant 0 : index
    %17 = vector.load %arg7[%c0_15, %c0_16] : memref<16x1xf32, #tpu.memory_space<vmem>>, vector<16x1xf32>
    %18 = vector.broadcast %17 : vector<16x1xf32> to vector<16x128xf32>
    %19 = arith.addf %16, %18 : vector<16x128xf32>
    %cst_17 = arith.constant 0.000000e+00 : f32
    %20 = vector.broadcast %cst_17 : f32 to vector<16x128xf32>
    %21 = arith.maximumf %19, %20 : vector<16x128xf32>
    %c0_18 = arith.constant 0 : index
    %c0_19 = arith.constant 0 : index
    %22 = vector.load %arg8[%c0_18, %c0_19] : memref<16x1xf32, #tpu.memory_space<vmem>>, vector<16x1xf32>
    %23 = vector.broadcast %22 : vector<16x1xf32> to vector<16x128xf32>
    %24 = arith.mulf %21, %23 : vector<16x128xf32>
    %cst_20 = arith.constant dense<0.000000e+00> : vector<128xf32>
    %25 = vector.multi_reduction <add>, %24, %cst_20 [0] : vector<16x128xf32> to vector<128xf32>
    %26 = vector.shape_cast %25 : vector<128xf32> to vector<1x128xf32>
    %c0_21 = arith.constant 0 : index
    %c0_22 = arith.constant 0 : index
    %27 = vector.load %arg9[%c0_21, %c0_22] : memref<1x1xf32, #tpu.memory_space<vmem>>, vector<1x1xf32>
    %28 = vector.broadcast %27 : vector<1x1xf32> to vector<1x128xf32>
    %29 = arith.addf %26, %28 : vector<1x128xf32>
    %c0_23 = arith.constant 0 : index
    %c0_24 = arith.constant 0 : index
    %30 = vector.load %arg10[%c0_23, %c0_24] : memref<1x128xf32, #tpu.memory_space<vmem>>, vector<1x128xf32>
    tpu.vector_store %arg10[%c0_23, %c0_24], %29 {strides = array<i32>} : memref<1x128xf32, #tpu.memory_space<vmem>>, vector<1x128xf32>,
    return
  }
  func.func @transform_0(%arg0: i32) -> (i32, i32) {
    %c0_i32 = arith.constant 0 : i32
    %c0_i32_0 = arith.constant 0 : i32
    return %arg0, %c0_i32 : i32, i32
  }
  func.func @transform_1(%arg0: i32) -> (i32, i32) {
    %c0_i32 = arith.constant 0 : i32
    %c0_i32_0 = arith.constant 0 : i32
    %c0_i32_1 = arith.constant 0 : i32
    return %c0_i32, %c0_i32_0 : i32, i32
  }
  func.func @transform_2(%arg0: i32) -> (i32, i32) {
    %c0_i32 = arith.constant 0 : i32
    %c0_i32_0 = arith.constant 0 : i32
    %c0_i32_1 = arith.constant 0 : i32
    return %c0_i32, %c0_i32_0 : i32, i32
  }
  func.func @transform_3(%arg0: i32) -> (i32, i32) {
    %c0_i32 = arith.constant 0 : i32
    %c0_i32_0 = arith.constant 0 : i32
    %c0_i32_1 = arith.constant 0 : i32
    return %c0_i32, %c0_i32_0 : i32, i32
  }
  func.func @transform_4(%arg0: i32) -> (i32, i32) {
    %c0_i32 = arith.constant 0 : i32
    %c0_i32_0 = arith.constant 0 : i32
    %c0_i32_1 = arith.constant 0 : i32
    return %c0_i32, %c0_i32_0 : i32, i32
  }
  func.func @transform_5(%arg0: i32) -> (i32, i32) {
    %c0_i32 = arith.constant 0 : i32
    %c0_i32_0 = arith.constant 0 : i32
    %c0_i32_1 = arith.constant 0 : i32
    return %c0_i32, %c0_i32_0 : i32, i32
  }
  func.func @transform_6(%arg0: i32) -> (i32, i32) {
    %c0_i32 = arith.constant 0 : i32
    %c0_i32_0 = arith.constant 0 : i32
    %c0_i32_1 = arith.constant 0 : i32
    return %c0_i32, %c0_i32_0 : i32, i32
  }
  func.func @transform_7(%arg0: i32) -> (i32, i32) {
    %c0_i32 = arith.constant 0 : i32
    %c0_i32_0 = arith.constant 0 : i32
    %c0_i32_1 = arith.constant 0 : i32
    return %c0_i32, %c0_i32_0 : i32, i32
  }
  func.func @transform_8(%arg0: i32) -> (i32, i32) {
    %c0_i32 = arith.constant 0 : i32
    %c0_i32_0 = arith.constant 0 : i32
    %c0_i32_1 = arith.constant 0 : i32
    return %c0_i32, %c0_i32_0 : i32, i32
  }
  func.func @transform_9(%arg0: i32) -> (i32, i32) {
    %c0_i32 = arith.constant 0 : i32
    %c0_i32_0 = arith.constant 0 : i32
    return %c0_i32, %arg0 : i32, i32
  }
}

</mosaic_0001>

<bundles_post_ra>
// kernel: bike_volume_nn_forward.1
= control target key start
LH: loop header
LB: loop body
LE: loop exit
PB: predicated region body
PF: predicated region fallthrough
CT: control target
= control target key end

     0   :  { %s1074_s0 = inlined_call_operand.vmem [shape: f32[8,25], index: 0, kind: input, shape index: {}]   ;;  %s1075_s1 = inlined_call_operand.vmem [shape: f32[64,25], index: 1, kind: input, shape index: {}]   ;;  %s1076_s2 = inlined_call_operand.vmem [shape: f32[64,1], index: 2, kind: input, shape index: {}]   ;;  %s1077_s3 = inlined_call_operand.vmem [shape: f32[32,64], index: 3, kind: input, shape index: {}]   ;;  %s1078_s4 = inlined_call_operand.vmem [shape: f32[32,1], index: 4, kind: input, shape index: {}]   ;;  %s1079_s5 = inlined_call_operand.vmem [shape: f32[16,32], index: 5, kind: input, shape index: {}]   ;;  %s1080_s6 = inlined_call_operand.vmem [shape: f32[16,1], index: 6, kind: input, shape index: {}]   ;;  %s1081_s7 = inlined_call_operand.vmem [shape: f32[16,1], index: 7, kind: input, shape index: {}]   ;;  %s1082_s8 = inlined_call_operand.<no memory space> [shape: f32[1,1], index: 8, kind: input, shape index: {}]   ;;  %s1083_s9 = inlined_call_operand.hbm [shape: f32[1,8], index: 9, kind: output, shape index: {}]  }
   0x1   :  { %v14_v0 = vstv %s1082_s8 }
   0x2   :  { %15 = vst [vmem:[#allocation2] sm:$0x1] %v14_v0 }
   0x3   :  { %v35_v1 = vld [vmem:[%s1074_s0] sm:$0xff]  ;;  %v36_v2 = vld [vmem:[%s1074_s0 + $0x8] sm:$0xff]  ;;  %vm107_vm0 = vcmask 203776   ;;  %v37_v3 = vld [vmem:[%s1074_s0 + $0x10] sm:$0xff]  ;;  %v817_v7 = vmov 0  }
   0x4   :  { %v717_v4 = vpack.c.bf16 %v36_v2, %v35_v1  ;;  %vm883_vm1 = vmpackc.low %vm107_vm0, %vm107_vm0  ;;  %v38_v6 = vld [vmem:[%s1074_s0 + $0x18] sm:$0xff]  ;;  %791 = vset.pattern.permute.xlu0 %v817_v7  ;;  %792 = vset.pattern.permute.xlu1 %v817_v7  ;;  %v51_v9 = vld [vmem:[%s1075_s1] sm:$0xff] }
   0x5   :  { %v723_v8 = vpack.c.bf16 %v38_v6, %v37_v3  ;;  %v39_v10 = vld [vmem:[%s1074_s0 + $0x20] sm:$0xff]  ;;  %v40_v11 = vld [vmem:[%s1074_s0 + $0x28] sm:$0xff]  ;;  %672 = vmatprep.mubr.msk.f32.mxu0 %vm107_vm0, %v51_v9  ;;  %v61_v14 = vld [vmem:[%s1076_s2 + $0x10] sm:$0xff] }
   0x6   :  { %719 = vmatprep.subr.msk.bf16.mxu0 %vm883_vm1, %v717_v4  ;;  %v59_v12 = vld [vmem:[%s1076_s2] sm:$0xff]  ;;  %v729_v13 = vpack.c.bf16 %v40_v11, %v39_v10  ;;  %v60_v15 = vld [vmem:[%s1076_s2 + $0x8] sm:$0xff]  ;;  %79 = vperm.xlu1 %792, %v61_v14   ;;  %v62_v16 = vld [vmem:[%s1076_s2 + $0x18] sm:$0xff] }
   0x7   :  { %722 = vmatpush3.bf16.xpose.msk.msra.mxu0 %vm883_vm1, %v717_v4  ;;  %69 = vperm.xlu0 %791, %v59_v12   ;;  %v41_v17 = vld [vmem:[%s1074_s0 + $0x30] sm:$0xff]  ;;  %v42_v18 = vld [vmem:[%s1074_s0 + $0x38] sm:$0xff]  ;;  %v63_v19 = vld [vmem:[%s1076_s2 + $0x20] sm:$0xff] }
   0x8   :  { %725 = vmatprep.subr.msk.bf16.mxu0 %vm883_vm1, %v723_v8 }
   0xa   :  { %84 = vperm.xlu1 %792, %v62_v16  }
   0xb   :  { %74 = vperm.xlu0 %791, %v60_v15  }
   0xf   :  { %728 = vmatpush3.bf16.xpose.msk.msra.mxu0 %vm883_vm1, %v723_v8 }
  0x10   :  { %731 = vmatprep.subr.msk.bf16.mxu0 %vm883_vm1, %v729_v13 }
  0x11   :  { %16 = vsyncpa [#allocation4], 0  ;;  %v64_v20 = vld [vmem:[%s1076_s2 + $0x28] sm:$0xff]  ;;  %v735_v21 = vpack.c.bf16 %v42_v18, %v41_v17  ;;  %89 = vperm.xlu0 %791, %v63_v19   ;;  %v65_v22 = vld [vmem:[%s1076_s2 + $0x30] sm:$0xff]  ;;  %vm321_vm2 = vcmask 523264   ;;  %vm437_vm3 = vcmask 261120  }
  0x12   :  { %94 = vperm.xlu1 %792, %v64_v20   ;;  %v66_v23 = vld [vmem:[%s1076_s2 + $0x38] sm:$0xff]  ;;  %v43_v24 = vld [vmem:[%s1074_s0 + $0x40] sm:$0xff]  ;;  %v44_v25 = vld [vmem:[%s1074_s0 + $0x48] sm:$0xff] }
  0x13   :  { %v297_v26 = vld [vmem:[%s1078_s4] sm:$0xff]  ;;  %v298_v27 = vld [vmem:[%s1078_s4 + $0x8] sm:$0xff]  ;;  %v741_v28 = vpack.c.bf16 %v44_v25, %v43_v24  ;;  %v299_v29 = vld [vmem:[%s1078_s4 + $0x10] sm:$0xff] }
  0x14   :  { %v300_v30 = vld [vmem:[%s1078_s4 + $0x18] sm:$0xff]  ;;  %v45_v31 = vld [vmem:[%s1074_s0 + $0x50] sm:$0xff]  ;;  %v425_v33 = vld [vmem:[%s1080_s6] sm:$0xff] }
  0x15   :  { %99 = vperm.xlu0 %791, %v65_v22   ;;  %v46_v32 = vld [vmem:[%s1074_s0 + $0x58] sm:$0xff]  ;;  %v426_v34 = vld [vmem:[%s1080_s6 + $0x8] sm:$0xff]  ;;  %v521_v36 = vld [vmem:[%s1081_s7] sm:$0xff] }
  0x16   :  { %104 = vperm.xlu1 %792, %v66_v23   ;;  %v747_v35 = vpack.c.bf16 %v46_v32, %v45_v31  ;;  %v522_v37 = vld [vmem:[%s1081_s7 + $0x8] sm:$0xff]  ;;  %v47_v38 = vld [vmem:[%s1074_s0 + $0x60] sm:$0xff]  ;;  %v49_v42 = vld [vmem:[%s1074_s0 + $0x70] sm:$0xff] }
  0x17   :  { %734 = vmatpush3.bf16.xpose.msk.msra.mxu0 %vm883_vm1, %v729_v13  ;;  %v48_v39 = vld [vmem:[%s1074_s0 + $0x68] sm:$0xff]  ;;  %v542_v40 = vld [vmem:[#allocation2] sm:$0x1]  ;;  %v50_v43 = vld [vmem:[%s1074_s0 + $0x78] sm:$0xff] }
  0x18   :  { %737 = vmatprep.subr.msk.bf16.mxu0 %vm883_vm1, %v735_v21  ;;  %v753_v41 = vpack.c.bf16 %v48_v39, %v47_v38  ;;  %v759_v44 = vpack.c.bf16 %v50_v43, %v49_v42  ;;  %v52_v45 = vld [vmem:[%s1075_s1 + $0x8] sm:$0xff]  ;;  %v53_v46 = vld [vmem:[%s1075_s1 + $0x10] sm:$0xff]  ;;  %v54_v47 = vld [vmem:[%s1075_s1 + $0x18] sm:$0xff] }
  0x19   :  { %303 = vperm.xlu0 %791, %v297_v26   ;;  %v55_v48 = vld [vmem:[%s1075_s1 + $0x20] sm:$0xff]  ;;  %v56_v49 = vld [vmem:[%s1075_s1 + $0x28] sm:$0xff]  ;;  %v57_v50 = vld [vmem:[%s1075_s1 + $0x30] sm:$0xff] }
  0x1a   :  { %308 = vperm.xlu1 %792, %v298_v27   ;;  %v58_v51 = vld [vmem:[%s1075_s1 + $0x38] sm:$0xff]  ;;  %v293_v52 = vld [vmem:[%s1077_s3] sm:$0xff]  ;;  %v294_v25 = vld [vmem:[%s1077_s3 + $0x8] sm:$0xff] }
  0x1b   :  { %700 = vmatprep.mubr.msk.f32.mxu1 %vm321_vm2, %v293_v52  ;;  %v295_v26 = vld [vmem:[%s1077_s3 + $0x10] sm:$0xff]  ;;  %v296_v27 = vld [vmem:[%s1077_s3 + $0x18] sm:$0xff] }
  0x1d   :  { %313 = vperm.xlu0 %791, %v299_v29  }
  0x1e   :  { %318 = vperm.xlu1 %792, %v300_v30  }
  0x1f   :  { %740 = vmatpush3.bf16.xpose.msk.msra.mxu0 %vm883_vm1, %v735_v21 }
  0x20   :  { %743 = vmatprep.subr.msk.bf16.mxu0 %vm883_vm1, %v741_v28 }
  0x21   :  { %429 = vperm.xlu0 %791, %v425_v33  }
  0x22   :  { %434 = vperm.xlu1 %792, %v426_v34  }
  0x25   :  { %525 = vperm.xlu0 %791, %v521_v36  }
  0x26   :  { %530 = vperm.xlu1 %792, %v522_v37  }
  0x27   :  { %746 = vmatpush3.bf16.xpose.msk.msra.mxu0 %vm883_vm1, %v741_v28  ;;  %v423_v28 = vld [vmem:[%s1079_s5] sm:$0xff] }
  0x28   :  { %749 = vmatprep.subr.msk.bf16.mxu0 %vm883_vm1, %v747_v35 }
  0x29   :  { %545 = vperm.xlu0 %791, %v542_v40  }
  0x2f   :  { %752 = vmatpush3.bf16.xpose.msk.msra.mxu0 %vm883_vm1, %v747_v35 }
  0x30   :  { %755 = vmatprep.subr.msk.bf16.mxu0 %vm883_vm1, %v753_v41 }
  0x37   :  { %758 = vmatpush3.bf16.xpose.msk.msra.mxu0 %vm883_vm1, %v753_v41 }
  0x38   :  { %761 = vmatprep.subr.msk.bf16.mxu0 %vm883_vm1, %v759_v44 }
  0x3f   :  { %764 = vmatpush3.bf16.xpose.msk.msra.mxu0 %vm883_vm1, %v759_v44 }
  0x46   :  { %673 = vmatmul.mubr.msk.f32.vlgmr.msra.gmra.mrb[0].mxu0 %vm107_vm0, %v52_v45 }
  0x47   :  { %675 = vmatprep.mubr.msk.f32.mxu0 %vm107_vm0, %v53_v46 }
  0x4a   :  { %676 = vmatmul.mubr.msk.f32.gmra.mrb[2].mxu0 %vm107_vm0, %v54_v47  ;;  %v424_v47 = vld [vmem:[%s1079_s5 + $0x8] sm:$0xff]  ;;  %s818_s5 = smov [#allocation3]  }
  0x4b   :  { %678 = vmatprep.mubr.msk.f32.mxu0 %vm107_vm0, %v55_v48  ;;  %s560_s25 = sshll.u32 %s818_s5, 4  ;;  %s561_s25 = int_to_ptr.vmem [resolvable:$true] %s560_s25 }
  0x4c   :  { %s793_s26 = scalar_lea.vmem %s561_s25, 16  ;;  %s797_s27 = scalar_lea.vmem %s561_s25, 32 }
  0x4d   :  { %p794_p0 = scmp.ne.s32.totalorder %s561_s25, %s793_s26  ;;  %p798_p1 = scmp.lt.s32.totalorder %s561_s25, %s561_s25 }
  0x4e   :  { %679 = vmatmul.mubr.msk.f32.gmra.mrb[4].mxu0 %vm107_vm0, %v56_v49  ;;  %p799_p2 = scmp.lt.s32.totalorder %s797_s27, %s793_s26 }
  0x4f   :  { %681 = vmatprep.mubr.msk.f32.mxu0 %vm107_vm0, %v57_v50 }
  0x50   :  { %p800_p3 = por %p799_p2, %p798_p1 }
  0x52   :  { %682 = vmatmul.mubr.msk.f32.gmra.mrb[6].mxu0 %vm107_vm0, %v58_v51  ;;  %p801_p4 = pnand %p800_p3, %p794_p0 }
  0x85   :  { %v80_v54 = vpop.permute.xlu1 %79 }
  0x86   :  { %v70_v53 = vpop.permute.xlu0 %69 }
  0x89   :  { %v85_v56 = vpop.permute.xlu1 %84 }
  0x8a   :  { %v75_v55 = vpop.permute.xlu0 %74 }
  0x90   :  { %v90_v5 = vpop.permute.xlu0 %89 }
  0x91   :  { %v95_v2 = vpop.permute.xlu1 %94 }
  0x94   :  { %v100_v17 = vpop.permute.xlu0 %99 }
  0x95   :  { %v105_v14 = vpop.permute.xlu1 %104 }
  0x98   :  { %v304_v30 = vpop.permute.xlu0 %303 }
  0x99   :  { %v309_v29 = vpop.permute.xlu1 %308 }
  0x9c   :  { %v314_v39 = vpop.permute.xlu0 %313 }
  0x9d   :  { %v319_v36 = vpop.permute.xlu1 %318 }
  0xa0   :  { %v430_v49 = vpop.permute.xlu0 %429 }
  0xa1   :  { %v435_v48 = vpop.permute.xlu1 %434 }
 0x119   :  { %v674_v57 = vpop.f32.mrb[0].mxu0 }
 0x11a   :  { %v252_v58 = vadd.f32 %v674_v57, %v75_v55  ;;  %v246_v59 = vpop.f32.mrb[1].mxu0  ;;  %v531_v55 = vpop.permute.xlu1 %530 }
 0x11b   :  { %v247_v60 = vadd.f32 %v246_v59, %v70_v53  ;;  %v526_v57 = vpop.permute.xlu0 %525 }
 0x11c   :  { %v286_v61 = vmax.f32 %v252_v58, 0.0 }
 0x11d   :  { %v285_v62 = vmax.f32 %v247_v60, 0.0  ;;  %v677_v63 = vpop.f32.mrb[2].mxu0  ;;  %v548_v60 = vlaneseq }
 0x11e   :  { %v262_v0 = vadd.f32 %v677_v63, %v85_v56  ;;  %v256_v1 = vpop.f32.mrb[3].mxu0 }
 0x11f   :  { %v257_v3 = vadd.f32 %v256_v1, %v80_v54  ;;  %v765_v4 = vpack.c.bf16 %v286_v61, %v285_v62  ;;  %v549_v63 = vshrl.u32 %v548_v60, 7 }
 0x120   :  { %v288_v6 = vmax.f32 %v262_v0, 0.0 }
 0x121   :  { %v287_v7 = vmax.f32 %v257_v3, 0.0  ;;  %v680_v8 = vpop.f32.mrb[4].mxu0  ;;  %766 = vmatprep.subr.bf16.mxu1 %v765_v4 }
 0x122   :  { %v272_v9 = vadd.f32 %v680_v8, %v95_v2  ;;  %v266_v10 = vpop.f32.mrb[5].mxu0  ;;  %768 = vmatpush3.bf16.msra.mxu1 %v765_v4  ;;  %v550_v2 = vsub.s32 0, %v549_v63  ;;  %v546_v4 = vpop.permute.xlu0 %545 }
 0x123   :  { %v769_v11 = vpack.c.bf16 %v288_v6, %v287_v7  ;;  %v267_v12 = vadd.f32 %v266_v10, %v90_v5 }
 0x124   :  { %v290_v13 = vmax.f32 %v272_v9, 0.0  ;;  %v551_v6 = vrot.slane %v546_v4, %v550_v2 }
 0x125   :  { %v289_v15 = vmax.f32 %v267_v12, 0.0  ;;  %v683_v16 = vpop.f32.mrb[6].mxu0  ;;  %770 = vmatprep.subr.bf16.mxu1 %v769_v11 }
 0x126   :  { %v282_v18 = vadd.f32 %v683_v16, %v105_v14  ;;  %v276_v19 = vpop.f32.mrb[7].mxu0  ;;  %772 = vmatpush3.bf16.msra.mxu1 %v769_v11 }
 0x127   :  { %v773_v20 = vpack.c.bf16 %v290_v13, %v289_v15  ;;  %v277_v21 = vadd.f32 %v276_v19, %v100_v17 }
 0x128   :  { %v292_v22 = vmax.f32 %v282_v18, 0.0 }
 0x129   :  { %v291_v23 = vmax.f32 %v277_v21, 0.0  ;;  %774 = vmatprep.subr.bf16.mxu1 %v773_v20 }
 0x12a   :  { %776 = vmatpush3.bf16.msra.mxu1 %v773_v20 }
 0x12b   :  { %v777_v24 = vpack.c.bf16 %v292_v22, %v291_v23 }
 0x12d   :  { %778 = vmatprep.subr.bf16.mxu1 %v777_v24 }
 0x12e   :  { %780 = vmatpush3.bf16.msra.mxu1 %v777_v24 }
 0x131   :  { %701 = vmatmul.mubr.msk.f32.vlgmr.msra.gmra.mrb[0].mxu1 %vm321_vm2, %v294_v25 }
 0x132   :  { %703 = vmatprep.mubr.msk.f32.mxu1 %vm321_vm2, %v295_v26 }
 0x135   :  { %704 = vmatmul.mubr.msk.f32.gmra.mrb[2].mxu1 %vm321_vm2, %v296_v27 }
 0x136   :  { %714 = vmatprep.mubr.msk.f32.mxu1 %vm437_vm3, %v423_v28 }
 0x204   :  { %v702_v31 = vpop.f32.mrb[0].mxu1 }
 0x205   :  { %v406_v32 = vadd.f32 %v702_v31, %v309_v29  ;;  %v400_v33 = vpop.f32.mrb[1].mxu1 }
 0x206   :  { %v401_v34 = vadd.f32 %v400_v33, %v304_v30 }
 0x207   :  { %v420_v35 = vmax.f32 %v406_v32, 0.0 }
 0x208   :  { %v419_v37 = vmax.f32 %v401_v34, 0.0  ;;  %v705_v38 = vpop.f32.mrb[2].mxu1 }
 0x209   :  { %v416_v40 = vadd.f32 %v705_v38, %v319_v36  ;;  %v410_v41 = vpop.f32.mrb[3].mxu1 }
 0x20a   :  { %v781_v42 = vpack.c.bf16 %v420_v35, %v419_v37  ;;  %v411_v43 = vadd.f32 %v410_v41, %v314_v39 }
 0x20b   :  { %v422_v44 = vmax.f32 %v416_v40, 0.0 }
 0x20c   :  { %v421_v45 = vmax.f32 %v411_v43, 0.0  ;;  %782 = vmatprep.subr.bf16.mxu1 %v781_v42 }
 0x20d   :  { %784 = vmatpush3.bf16.msra.mxu1 %v781_v42 }
 0x20e   :  { %v785_v46 = vpack.c.bf16 %v422_v44, %v421_v45 }
 0x210   :  { %786 = vmatprep.subr.bf16.mxu1 %v785_v46 }
 0x211   :  { %788 = vmatpush3.bf16.msra.mxu1 %v785_v46 }
 0x214   :  { %715 = vmatmul.mubr.msk.f32.vlgmr.msra.gmra.mrb[4].mxu1 %vm437_vm3, %v424_v47 }
 0x2e7   :  { %v716_v50 = vpop.f32.mrb[4].mxu1 }
 0x2e8   :  { %v516_v51 = vadd.f32 %v716_v50, %v435_v48  ;;  %v510_v52 = vpop.f32.mrb[5].mxu1 }
 0x2e9   :  { %v511_v53 = vadd.f32 %v510_v52, %v430_v49 }
 0x2ea   :  { %v520_v54 = vmax.f32 %v516_v51, 0.0 }
 0x2eb   :  { %v519_v56 = vmax.f32 %v511_v53, 0.0 }
 0x2ec   :  { %v534_v58 = vmul.f32 %v531_v55, %v520_v54 }
 0x2ed   :  { %v533_v59 = vmul.f32 %v526_v57, %v519_v56 }
 0x2ef   :  { %v535_v61 = vadd.f32 %v534_v58, %v533_v59 }
 0x2f1   :  { %v536_v62 = vrot.slane %v535_v61, 4 }
 0x2f3   :  { %v537_v0 = vadd.f32 %v536_v62, %v535_v61 }
 0x2f5   :  { %v538_v1 = vrot.slane %v537_v0, 2 }
 0x2f7   :  { %v539_v3 = vadd.f32 %v538_v1, %v537_v0 }
 0x2f9   :  { %v540_v5 = vrot.slane %v539_v3, 1 }
 0x2fb   :  { %v541_v7 = vadd.f32 %v540_v5, %v539_v3 }
 0x2fd   :  { %v552_v8 = vadd.f32 %v551_v6, %v541_v7 }
 0x2ff   :  { %553 = vst [vmem:[#allocation3] sm:$0x1] %v552_v8 }
 0x300   :  { %804 = shalt.err (!%p801_p4)
}
 0x301   :  { %s805_s29 = scalar_lea.hbm %s1083_s9, 16 }
 0x302   :  { %p806_p5 = scmp.ne.s32.totalorder %s1083_s9, %s805_s29  ;;  %p809_p6 = scmp.lt.u32.totalorder %s805_s29, %s1083_s9 }
 0x304   :  { %p811_p7 = pnand %p809_p6, %p806_p5 }
 0x306   :  { %814 = shalt.err (!%p811_p7)
}
 0x307   :  { %563 = dma.vmem_to_hbm [thread:$0]  %s561_s25, 16, %s1083_s9, [#allocation4]  }
 0x308   :  { %815 = dma.done.wait [#allocation4], 16  }
 0x309   :  { %816 = vsyncadd [#allocation4], 4294967280 }
 0x30a   :  { %567 = vsyncpa [#allocation4], 1 }

</bundles_post_ra>
